<compile_context>
chip_gen: v7x
topology: tpu7x:2x2x1
jax: 0.10.0
libtpu: 0.0.40
codegen_flags: <defaults>
</compile_context>

<pallas_src>
from typing import NamedTuple

import jax
import jax.numpy as jnp
from jax.experimental import pallas as pl
from jax.experimental.pallas import tpu as pltpu


def _round_up(x, m):
    return (x + m - 1) // m * m


def _vmem_capacity_bytes():
    try:
        return int(pltpu.get_tpu_info().vmem_capacity_bytes)
    except Exception:
        return 64 << 20  # conservative (v7x per-core VMEM)


# ----------------------------- kernels --------------------------------------


def _proj_logsumexp_kernel(x_ref, w_ref, b_ref, logits_ref, logz_ref, m_sc, l_sc):
    # x_ref:      (tm, D)   bf16/f32 -- same block for every vocab step of a row tile
    # w_ref:      (D, tv)   bf16/f32 -- one vocab tile of the projection weights
    # b_ref:      (1, tv)   f32
    # logits_ref: (tm, tv)  out dtype -- UNNORMALIZED logits, new block each vocab step
    # logz_ref:   (tm, 128) f32       -- per-row log-normalizer, resident across vocab steps
    # m_sc, l_sc: (tm, 1)   f32       -- running max / running sum-exp
    k = pl.program_id(1)

    @pl.when(k == 0)
    def _():
        m_sc[...] = jnp.full_like(m_sc, -jnp.inf)
        l_sc[...] = jnp.zeros_like(l_sc)

    # Projection on the MXU with f32 accumulation; bias added in f32.
    logits = jnp.dot(x_ref[...], w_ref[...], preferred_element_type=jnp.float32)
    logits = logits + b_ref[...]

    # Online (streaming) max / sum-exp across vocab tiles.
    m_new = jnp.maximum(m_sc[...], jnp.max(logits, axis=-1, keepdims=True))
    alpha = jnp.exp(m_sc[...] - m_new)
    l_sc[...] = alpha * l_sc[...] + jnp.sum(jnp.exp(logits - m_new),
                                            axis=-1, keepdims=True)
    m_sc[...] = m_new

    # Write this vocab tile's raw logits straight to the (lane-dense) output.
    logits_ref[...] = logits.astype(logits_ref.dtype)

    # Finalize: emit the per-row log-sum-exp once per row tile.
    @pl.when(k == pl.num_programs(1) - 1)
    def _():
        log_z = m_sc[...] + jnp.log(l_sc[...])
        logz_ref[...] = jnp.broadcast_to(log_z, logz_ref.shape)


def _normalize_kernel(logits_ref, logz_ref, o_ref):
    # logits_ref: (tm, tv)  unnormalized logits (aliased with o_ref)
    # logz_ref:   (tm, 128) f32 per-row log-normalizer (broadcast along lanes)
    # o_ref:      (tm, tv)  log-probabilities
    log_z = logz_ref[...][:, :1]
    o_ref[...] = (logits_ref[...].astype(jnp.float32) - log_z).astype(o_ref.dtype)


# ----------------------------- wrappers --------------------------------------


class GeneratorParams(NamedTuple):
    w: jax.Array        # (D, Vp) compute dtype, vocab-padded
    b: jax.Array        # (1, Vp) f32, padded columns = -1e30
    d_model: int
    vocab: int
    vocab_padded: int
    tv: int


def prepare_generator_params(w, b, *, tv=512, use_bf16=True):
    """Pad + cast the projection weights ONCE (hoisted out of the forward path).

    w: (d_model, vocab); b: (vocab,)
    """
    D, V = w.shape
    cdt = jnp.bfloat16 if use_bf16 else w.dtype

    if V >= 256:
        # Keep tv a multiple of 256 so the 256-wide MXU (v6e/v7x) stays full.
        tv_ = max(256, min(_round_up(tv, 256), _round_up(V, 256)))
    else:
        tv_ = 128
    Vp = _round_up(V, tv_)

    w2 = w.astype(cdt)
    b2 = b.astype(jnp.float32).reshape(1, V)
    if Vp != V:
        w2 = jnp.pad(w2, ((0, 0), (0, Vp - V)))
        # Padded vocab columns get a hugely negative bias so exp() underflows
        # to 0 and they never perturb the real columns' log-sum-exp.
        b2 = jnp.pad(b2, ((0, 0), (0, Vp - V)), constant_values=-1e30)
    return GeneratorParams(w2, b2, D, V, Vp, tv_)


def generator_forward(x, params: GeneratorParams, *, tm=512, out_dtype=jnp.bfloat16):
    """x: (..., d_model). Returns (..., vocab) log-probabilities."""
    D = params.d_model
    assert x.shape[-1] == D, "weight / input feature mismatch"
    V, Vp, tv = params.vocab, params.vocab_padded, params.tv
    cdt = params.w.dtype

    lead = x.shape[:-1]
    M = 1
    for s in lead:
        M *= s

    # --- row tile sizing ---
    row_align = 16                              # safe sublane multiple (f32 & bf16)
    Mp_min = _round_up(max(M, 1), row_align)
    tm_ = min(_round_up(tm, row_align), Mp_min)
    if tm_ >= Mp_min and Mp_min >= 512:
        # Split into >=2 row tiles so the 'parallel' axis shards across
        # v7x's two TensorCores (multiple of 256 for the MXU).
        tm_ = _round_up((Mp_min + 1) // 2, 256)
    Mp = _round_up(max(M, 1), tm_)

    # --- pad & cast activations ---
    x2 = x.reshape(M, D).astype(cdt)
    if Mp != M:
        x2 = jnp.pad(x2, ((0, Mp - M), (0, 0)))

    grid = (Mp // tm_, Vp // tv)

    # --- VMEM budget: double-buffered tiles + scratch, clamped to physical VMEM ---
    in_it = jnp.dtype(cdt).itemsize
    out_it = jnp.dtype(out_dtype).itemsize
    vmem_est = (2 * tm_ * D * in_it          # x tiles
                + 2 * D * tv * in_it         # W tiles
                + 2 * 8 * tv * 4             # bias tiles (sublane-padded)
                + 2 * tm_ * tv * out_it      # unnormalized-logits output tiles
                + 2 * tm_ * 128 * 4          # log_z output tiles
                + 2 * tm_ * 4)               # running max / sum-exp scratch
    cap = _vmem_capacity_bytes()
    vmem_limit = max(int(1.5 * vmem_est) + (4 << 20), 32 << 20)
    vmem_limit = min(vmem_limit, max(cap - (8 << 20), 16 << 20))

    # --- pass 1: projection + online log-sum-exp ---
    unnorm, logz = pl.pallas_call(
        _proj_logsumexp_kernel,
        out_shape=(jax.ShapeDtypeStruct((Mp, Vp), out_dtype),
                   jax.ShapeDtypeStruct((Mp, 128), jnp.float32)),
        grid_spec=pltpu.PrefetchScalarGridSpec(
            num_scalar_prefetch=0,
            grid=grid,
            in_specs=[
                pl.BlockSpec((tm_, D), lambda i, k: (i, 0)),   # row tile of x
                pl.BlockSpec((D, tv), lambda i, k: (0, k)),    # vocab tile of W
                pl.BlockSpec((1, tv), lambda i, k: (0, k)),    # vocab tile of bias
            ],
            out_specs=[
                pl.BlockSpec((tm_, tv), lambda i, k: (i, k)),  # raw logits tile
                pl.BlockSpec((tm_, 128), lambda i, k: (i, 0)),  # per-row log_z
            ],
            scratch_shapes=[
                pltpu.VMEM((tm_, 1), jnp.float32),   # running max
                pltpu.VMEM((tm_, 1), jnp.float32),   # running sum-exp
            ],
        ),
        compiler_params=pltpu.CompilerParams(
            dimension_semantics=("parallel", "arbitrary"),
            vmem_limit_bytes=vmem_limit,
        ),
    )(x2, params.w, params.b)

    # --- pass 2: subtract log_z (in-place over the unnormalized buffer) ---
    out2 = pl.pallas_call(
        _normalize_kernel,
        out_shape=jax.ShapeDtypeStruct((Mp, Vp), out_dtype),
        grid_spec=pltpu.PrefetchScalarGridSpec(
            num_scalar_prefetch=0,
            grid=grid,
            in_specs=[
                pl.BlockSpec((tm_, tv), lambda i, k: (i, k)),
                pl.BlockSpec((tm_, 128), lambda i, k: (i, 0)),
            ],
            out_specs=pl.BlockSpec((tm_, tv), lambda i, k: (i, k)),
        ),
        input_output_aliases={0: 0},
        compiler_params=pltpu.CompilerParams(
            dimension_semantics=("parallel", "parallel"),
            vmem_limit_bytes=vmem_limit,
        ),
    )(unnorm, logz)

    return out2[:M, :V].reshape(*lead, V)


def _reference(x, w, b):
    logits = jnp.einsum("bsd,dv->bsv", x, w) + b
    return jax.nn.log_softmax(logits, axis=-1)


if __name__ == "__main__":
    # Small shapes consistent with the module: d_model=32, vocab=128,
    # x of shape (batch=2, seq=8, d_model=32).
    d_model, vocab = 32, 128
    B, S = 2, 8

    key = jax.random.PRNGKey(0)
    kx, kw, kb = jax.random.split(key, 3)

    # Deterministic init mimicking nn.Linear's uniform(-1/sqrt(d), 1/sqrt(d)).
    bound = 1.0 / (d_model ** 0.5)
    w = jax.random.uniform(kw, (d_model, vocab), jnp.float32, -bound, bound)
    b = jax.random.uniform(kb, (vocab,), jnp.float32, -bound, bound)
    x = jax.random.normal(kx, (B, S, d_model), jnp.float32)

    # Weights are prepared (padded + cast) once, outside the per-call path.
    params = prepare_generator_params(w, b)
    fwd = jax.jit(lambda inp: generator_forward(inp, params))

    out = fwd(x)
    out = jax.block_until_ready(out)

    ref = _reference(x, w, b)
    assert out.shape == (B, S, vocab)
    out_f32 = out.astype(jnp.float32)
    # bf16 matmul / bf16 output (f32 accumulation + f32 softmax stats) ->
    # loosened tolerance vs the f32 reference.
    assert jnp.allclose(out_f32, ref, atol=3e-2, rtol=3e-2), "mismatch vs reference"
    # log_softmax rows should exponentiate-sum to 1.
    assert jnp.allclose(jnp.sum(jnp.exp(out_f32), axis=-1), 1.0, atol=2e-2)

    print("KERNEL_OK")
</pallas_src>

<mosaic_0001>
module attributes {stable_mosaic.version = 11 : i64} {
  func.func @_normalize_kernel(%arg0: i32, %arg1: i32, %arg2: memref<16x128xbf16, #tpu.memory_space<vmem>>, %arg3: memref<16x128xf32, #tpu.memory_space<vmem>>, %arg4: memref<16x128xbf16, #tpu.memory_space<vmem>>) attributes {dimension_semantics = [#tpu.dimension_semantics<parallel>, #tpu.dimension_semantics<parallel>], iteration_bounds = array<i64: 1, 1>, scalar_prefetch = 0 : i64, scratch_operands = 0 : i64, tpu.core_type = #tpu.core_type<tc>, window_params = [{transform_indices = @transform_0, window_bounds = array<i64: 16, 128>}, {transform_indices = @transform_1, window_bounds = array<i64: 16, 128>}, {transform_indices = @transform_2, window_bounds = array<i64: 16, 128>}]} {
    %c0 = arith.constant 0 : index
    %c0_0 = arith.constant 0 : index
    %0 = vector.load %arg3[%c0, %c0_0] : memref<16x128xf32, #tpu.memory_space<vmem>>, vector<16x128xf32>
    %1 = vector.extract_strided_slice %0 {offsets = [0, 0], sizes = [16, 1], strides = [1, 1]} : vector<16x128xf32> to vector<16x1xf32>
    %c0_1 = arith.constant 0 : index
    %c0_2 = arith.constant 0 : index
    %2 = vector.load %arg2[%c0_1, %c0_2] : memref<16x128xbf16, #tpu.memory_space<vmem>>, vector<16x128xbf16>
    %3 = arith.extf %2 : vector<16x128xbf16> to vector<16x128xf32>
    %4 = vector.broadcast %1 : vector<16x1xf32> to vector<16x128xf32>
    %5 = arith.subf %3, %4 : vector<16x128xf32>
    %6 = arith.truncf %5 : vector<16x128xf32> to vector<16x128xbf16>
    %c0_3 = arith.constant 0 : index
    %c0_4 = arith.constant 0 : index
    %7 = vector.load %arg4[%c0_3, %c0_4] : memref<16x128xbf16, #tpu.memory_space<vmem>>, vector<16x128xbf16>
    tpu.vector_store %arg4[%c0_3, %c0_4], %6 {strides = array<i32>} : memref<16x128xbf16, #tpu.memory_space<vmem>>, vector<16x128xbf16>,
    return
  }
  func.func @transform_0(%arg0: i32, %arg1: i32) -> (i32, i32) {
    %c0_i32 = arith.constant 0 : i32
    return %arg0, %arg1 : i32, i32
  }
  func.func @transform_1(%arg0: i32, %arg1: i32) -> (i32, i32) {
    %c0_i32 = arith.constant 0 : i32
    %c0_i32_0 = arith.constant 0 : i32
    return %arg0, %c0_i32 : i32, i32
  }
  func.func @transform_2(%arg0: i32, %arg1: i32) -> (i32, i32) {
    %c0_i32 = arith.constant 0 : i32
    return %arg0, %arg1 : i32, i32
  }
}

module attributes {stable_mosaic.version = 11 : i64} {
  func.func @_proj_logsumexp_kernel(%arg0: i32, %arg1: i32, %arg2: memref<16x32xbf16, #tpu.memory_space<vmem>>, %arg3: memref<32x128xbf16, #tpu.memory_space<vmem>>, %arg4: memref<1x128xf32, #tpu.memory_space<vmem>>, %arg5: memref<16x128xbf16, #tpu.memory_space<vmem>>, %arg6: memref<16x128xf32, #tpu.memory_space<vmem>>, %arg7: memref<16x1xf32, #tpu.memory_space<vmem>>, %arg8: memref<16x1xf32, #tpu.memory_space<vmem>>) attributes {dimension_semantics = [#tpu.dimension_semantics<parallel>, #tpu.dimension_semantics<arbitrary>], iteration_bounds = array<i64: 1, 1>, scalar_prefetch = 0 : i64, scratch_operands = 2 : i64, tpu.core_type = #tpu.core_type<tc>, window_params = [{transform_indices = @transform_0, window_bounds = array<i64: 16, 32>}, {transform_indices = @transform_1, window_bounds = array<i64: 32, 128>}, {transform_indices = @transform_2, window_bounds = array<i64: 1, 128>}, {transform_indices = @transform_3, window_bounds = array<i64: 16, 128>}, {transform_indices = @transform_4, window_bounds = array<i64: 16, 128>}]} {
    %c0_i32 = arith.constant 0 : i32
    %0 = arith.cmpi eq, %arg1, %c0_i32 : i32
    %1 = arith.extui %0 : i1 to i32
    %c0_i32_0 = arith.constant 0 : i32
    %2 = arith.cmpi ne, %1, %c0_i32_0 : i32
    scf.if %2 {
      %cst_22 = arith.constant 0xFF800000 : f32
      %31 = vector.broadcast %cst_22 : f32 to vector<16x1xf32>
      %c0_23 = arith.constant 0 : index
      %c0_24 = arith.constant 0 : index
      %32 = vector.load %arg7[%c0_23, %c0_24] : memref<16x1xf32, #tpu.memory_space<vmem>>, vector<16x1xf32>
      tpu.vector_store %arg7[%c0_23, %c0_24], %31 {strides = array<i32>} : memref<16x1xf32, #tpu.memory_space<vmem>>, vector<16x1xf32>,
      %cst_25 = arith.constant 0.000000e+00 : f32
      %33 = vector.broadcast %cst_25 : f32 to vector<16x1xf32>
      %c0_26 = arith.constant 0 : index
      %c0_27 = arith.constant 0 : index
      %34 = vector.load %arg8[%c0_26, %c0_27] : memref<16x1xf32, #tpu.memory_space<vmem>>, vector<16x1xf32>
      tpu.vector_store %arg8[%c0_26, %c0_27], %33 {strides = array<i32>} : memref<16x1xf32, #tpu.memory_space<vmem>>, vector<16x1xf32>,
    } else {
    }
    %c0 = arith.constant 0 : index
    %c0_1 = arith.constant 0 : index
    %3 = vector.load %arg2[%c0, %c0_1] : memref<16x32xbf16, #tpu.memory_space<vmem>>, vector<16x32xbf16>
    %c0_2 = arith.constant 0 : index
    %c0_3 = arith.constant 0 : index
    %4 = vector.load %arg3[%c0_2, %c0_3] : memref<32x128xbf16, #tpu.memory_space<vmem>>, vector<32x128xbf16>
    %cst = arith.constant dense<0.000000e+00> : vector<16x128xf32>
    %5 = tpu.matmul %3, %4, %cst {dimension_numbers = #tpu.dot_dimension_numbers<[1], [0], [0], [1], [0, 0, 1, 1], [], []>} : vector<16x32xbf16>, vector<32x128xbf16>, vector<16x128xf32> -> vector<16x128xf32>
    %c0_4 = arith.constant 0 : index
    %c0_5 = arith.constant 0 : index
    %6 = vector.load %arg4[%c0_4, %c0_5] : memref<1x128xf32, #tpu.memory_space<vmem>>, vector<1x128xf32>
    %7 = vector.broadcast %6 : vector<1x128xf32> to vector<16x128xf32>
    %8 = arith.addf %5, %7 : vector<16x128xf32>
    %c0_6 = arith.constant 0 : index
    %c0_7 = arith.constant 0 : index
    %9 = vector.load %arg7[%c0_6, %c0_7] : memref<16x1xf32, #tpu.memory_space<vmem>>, vector<16x1xf32>
    %cst_8 = arith.constant dense<0xFF800000> : vector<16xf32>
    %10 = vector.multi_reduction <maximumf>, %8, %cst_8 [1] : vector<16x128xf32> to vector<16xf32>
    %11 = vector.shape_cast %10 : vector<16xf32> to vector<16x1xf32>
    %12 = arith.maximumf %9, %11 : vector<16x1xf32>
    %c0_9 = arith.constant 0 : index
    %c0_10 = arith.constant 0 : index
    %13 = vector.load %arg7[%c0_9, %c0_10] : memref<16x1xf32, #tpu.memory_space<vmem>>, vector<16x1xf32>
    %14 = arith.subf %13, %12 : vector<16x1xf32>
    %15 = math.exp %14 : vector<16x1xf32>
    %c0_11 = arith.constant 0 : index
    %c0_12 = arith.constant 0 : index
    %16 = vector.load %arg8[%c0_11, %c0_12] : memref<16x1xf32, #tpu.memory_space<vmem>>, vector<16x1xf32>
    %17 = arith.mulf %15, %16 : vector<16x1xf32>
    %18 = vector.broadcast %12 : vector<16x1xf32> to vector<16x128xf32>
    %19 = arith.subf %8, %18 : vector<16x128xf32>
    %20 = math.exp %19 : vector<16x128xf32>
    %cst_13 = arith.constant dense<0.000000e+00> : vector<16xf32>
    %21 = vector.multi_reduction <add>, %20, %cst_13 [1] : vector<16x128xf32> to vector<16xf32>
    %22 = vector.shape_cast %21 : vector<16xf32> to vector<16x1xf32>
    %23 = arith.addf %17, %22 : vector<16x1xf32>
    %c0_14 = arith.constant 0 : index
    %c0_15 = arith.constant 0 : index
    %24 = vector.load %arg8[%c0_14, %c0_15] : memref<16x1xf32, #tpu.memory_space<vmem>>, vector<16x1xf32>
    tpu.vector_store %arg8[%c0_14, %c0_15], %23 {strides = array<i32>} : memref<16x1xf32, #tpu.memory_space<vmem>>, vector<16x1xf32>,
    %c0_16 = arith.constant 0 : index
    %c0_17 = arith.constant 0 : index
    %25 = vector.load %arg7[%c0_16, %c0_17] : memref<16x1xf32, #tpu.memory_space<vmem>>, vector<16x1xf32>
    tpu.vector_store %arg7[%c0_16, %c0_17], %12 {strides = array<i32>} : memref<16x1xf32, #tpu.memory_space<vmem>>, vector<16x1xf32>,
    %26 = arith.truncf %8 : vector<16x128xf32> to vector<16x128xbf16>
    %c0_18 = arith.constant 0 : index
    %c0_19 = arith.constant 0 : index
    %27 = vector.load %arg5[%c0_18, %c0_19] : memref<16x128xbf16, #tpu.memory_space<vmem>>, vector<16x128xbf16>
    tpu.vector_store %arg5[%c0_18, %c0_19], %26 {strides = array<i32>} : memref<16x128xbf16, #tpu.memory_space<vmem>>, vector<16x128xbf16>,
    %c0_i32_20 = arith.constant 0 : i32
    %28 = arith.cmpi eq, %arg1, %c0_i32_20 : i32
    %29 = arith.extui %28 : i1 to i32
    %c0_i32_21 = arith.constant 0 : i32
    %30 = arith.cmpi ne, %29, %c0_i32_21 : i32
    scf.if %30 {
      %c0_22 = arith.constant 0 : index
      %c0_23 = arith.constant 0 : index
      %31 = vector.load %arg7[%c0_22, %c0_23] : memref<16x1xf32, #tpu.memory_space<vmem>>, vector<16x1xf32>
      %c0_24 = arith.constant 0 : index
      %c0_25 = arith.constant 0 : index
      %32 = vector.load %arg8[%c0_24, %c0_25] : memref<16x1xf32, #tpu.memory_space<vmem>>, vector<16x1xf32>
      %33 = math.log %32 : vector<16x1xf32>
      %34 = arith.addf %31, %33 : vector<16x1xf32>
      %35 = vector.shape_cast %34 : vector<16x1xf32> to vector<16x1xf32>
      %36 = vector.broadcast %35 : vector<16x1xf32> to vector<16x128xf32>
      %c0_26 = arith.constant 0 : index
      %c0_27 = arith.constant 0 : index
      %37 = vector.load %arg6[%c0_26, %c0_27] : memref<16x128xf32, #tpu.memory_space<vmem>>, vector<16x128xf32>
      tpu.vector_store %arg6[%c0_26, %c0_27], %36 {strides = array<i32>} : memref<16x128xf32, #tpu.memory_space<vmem>>, vector<16x128xf32>,
    } else {
    }
    return
  }
  func.func @transform_0(%arg0: i32, %arg1: i32) -> (i32, i32) {
    %c0_i32 = arith.constant 0 : i32
    %c0_i32_0 = arith.constant 0 : i32
    return %arg0, %c0_i32 : i32, i32
  }
  func.func @transform_1(%arg0: i32, %arg1: i32) -> (i32, i32) {
    %c0_i32 = arith.constant 0 : i32
    %c0_i32_0 = arith.constant 0 : i32
    return %c0_i32, %arg1 : i32, i32
  }
  func.func @transform_2(%arg0: i32, %arg1: i32) -> (i32, i32) {
    %c0_i32 = arith.constant 0 : i32
    %c0_i32_0 = arith.constant 0 : i32
    return %c0_i32, %arg1 : i32, i32
  }
  func.func @transform_3(%arg0: i32, %arg1: i32) -> (i32, i32) {
    %c0_i32 = arith.constant 0 : i32
    return %arg0, %arg1 : i32, i32
  }
  func.func @transform_4(%arg0: i32, %arg1: i32) -> (i32, i32) {
    %c0_i32 = arith.constant 0 : i32
    %c0_i32_0 = arith.constant 0 : i32
    return %arg0, %c0_i32 : i32, i32
  }
}

</mosaic_0001>

<bundles_post_ra>
// kernel: _lambda_.3
= control target key start
LH: loop header
LB: loop body
LE: loop exit
PB: predicated region body
PF: predicated region fallthrough
CT: control target
= control target key end

     0   :  { %v58_v0 = vmov 0   ;;  %s86_s1 = inlined_call_operand.vmem [shape: f32[16,128], index: 1, kind: input, shape index: {}]   ;;  %s87_s0 = inlined_call_operand.vmem [shape: bf16[16,128], index: 0, kind: input, shape index: {}, may-alias: {0,2}]   ;;  %s88_s2 = inlined_call_operand.vmem [shape: bf16[16,128], index: 2, kind: output, shape index: {}, may-alias: {0,2}]  }
   0x1   :  { %57 = vset.pattern.permute.xlu0 %v58_v0  ;;  %v11_v1 = vld [vmem:[%s86_s1] sm:$0xff]  ;;  %v12_v2 = vld [vmem:[%s86_s1 + $0x8] sm:$0xff] }
   0x2   :  { %19 = vperm.xlu0 %57, %v11_v1   ;;  %v48_v3 = vld [vmem:[%s87_s0] sm:$0xff]  }
   0x3   :  { %v49_v5 = vunpack.c.l.bf16 %v48_v3  ;;  %v50_v6 = vunpack.c.h.bf16 %v48_v3 }
   0x6   :  { %24 = vperm.xlu0 %57, %v12_v2  }
  0x81   :  { %v20_v4 = vpop.permute.xlu0 %19 }
  0x82   :  { %v27_v8 = vsub.f32 %v49_v5, %v20_v4 }
  0x85   :  { %v25_v7 = vpop.permute.xlu0 %24 }
  0x86   :  { %v28_v9 = vsub.f32 %v50_v6, %v25_v7 }
  0x88   :  { %v54_v10 = vpack.c.bf16 %v28_v9, %v27_v8 }
  0x8a   :  { %55 = vst [vmem:[%s88_s2] sm:$0xff] %v54_v10  }

// kernel: _lambda_.2
= control target key start
LH: loop header
LB: loop body
LE: loop exit
PB: predicated region body
PF: predicated region fallthrough
CT: control target
= control target key end

     0   :  { %v235_v0 = vmov 0.0   ;;  %vm236_vm0 = vmmov 0   ;;  %vm56_vm1 = vcmask 261120   ;;  %vm21_vm2 = vcmask 7168   ;;  %s293_s1 = inlined_call_operand.vmem [shape: bf16[32,128], index: 1, kind: input, shape index: {}]   ;;  %s294_s0 = inlined_call_operand.vmem [shape: bf16[16,32], index: 0, kind: input, shape index: {}]   ;;  %s295_s2 = inlined_call_operand.vmem [shape: f32[1,128], index: 2, kind: input, shape index: {}]   ;;  %s296_s3 = inlined_call_operand.vmem [shape: bf16[16,128], index: 3, kind: output, shape index: {0}]   ;;  %s297_s4 = inlined_call_operand.vmem [shape: f32[16,128], index: 4, kind: output, shape index: {1}]  }
   0x1   :  { %206 = vmatprep.subr.bf16.mxu0 %v235_v0  ;;  %v220_v1 = vld [vmem:[%s293_s1] sm:$0xff]   ;;  %210 = vmatprep.mubr.msk.bf16.mxu0 %vm236_vm0, %v235_v0  ;;  %v221_v2 = vld [vmem:[%s293_s1 + $0x8] sm:$0xff]   ;;  %v237_v4 = vmov -inf   ;;  %24 = vst.msk [vmem:[#allocation3] sm:$0xff] %vm21_vm2, %v235_v0  ;;  %25 = vst.msk [vmem:[#allocation3 + $0x8] sm:$0xff] %vm21_vm2, %v235_v0  ;;  %v238_v13 = vmov 0  }
   0x2   :  { %207 = vmatpush3.bf16.msra.mxu0 %v220_v1  ;;  %v222_v3 = vld [vmem:[%s294_s0] sm:$0xff]   ;;  %22 = vst.msk [vmem:[#allocation2] sm:$0xff] %vm21_vm2, %v237_v4  ;;  %23 = vst.msk [vmem:[#allocation2 + $0x8] sm:$0xff] %vm21_vm2, %v237_v4  ;;  %218 = vset.pattern.permute.xlu1 %v238_v13 }
   0x3   :  { %208 = vmatprep.subr.bf16.mxu0 %v235_v0  ;;  %v189_v5 = vld [vmem:[%s295_s2] ss:$0 sm:$0xff]  ;;  %219 = vset.pattern.permute.xlu0 %v238_v13 }
   0x6   :  { %209 = vmatpush3.bf16.msra.mxu0 %v221_v2 }
   0x8   :  { %v115_v33 = vld [vmem:[#allocation3] sm:$0xff]  ;;  %v116_v37 = vld [vmem:[#allocation3 + $0x8] sm:$0xff] }
   0x9   :  { %211 = vmatmul.mubr.msk.bf16.vlgmr.msra.gmra.mrb[0].mxu0 %vm56_vm1, %v222_v3  ;;  %v101_v14 = vld [vmem:[#allocation2] sm:$0xff]  ;;  %v102_v17 = vld [vmem:[#allocation2 + $0x8] sm:$0xff] }
  0xdc   :  { %v94_v6 = vpop.f32.mrb[0].mxu0 }
  0xdd   :  { %v95_v7 = vadd.f32 %v189_v5, %v94_v6  ;;  %v212_v8 = vpop.f32.mrb[1].mxu0 }
  0xde   :  { %v97_v9 = vpop.f32.mrb[2].mxu0 }
  0xdf   :  { %v98_v10 = vadd.f32 %v189_v5, %v97_v9  ;;  %103 = vmax.xlane.f32.xlu0 %v95_v7  ;;  %v213_v11 = vpop.f32.mrb[3].mxu0 }
  0xe1   :  { %v201_v12 = vpack.c.bf16 %v98_v10, %v95_v7 }
  0xe3   :  { %202 = vst [vmem:[%s296_s3] sm:$0xff] %v201_v12   ;;  %105 = vmax.xlane.f32.xlu0 %v98_v10 }
 0x16c   :  { %v104_v15 = vpop.xlane.xlu0 %103 }
 0x16d   :  { %v107_v16 = vmax.f32 %v101_v14, %v104_v15 }
 0x16f   :  { %v109_v18 = vsub.f32 %v101_v14, %v107_v16  ;;  %144 = vst.msk [vmem:[#allocation2] sm:$0xff] %vm21_vm2, %v107_v16  ;;  %121 = vperm.xlu1 %218, %v107_v16  }
 0x170   :  { %v106_v19 = vpop.xlane.xlu0 %105 }
 0x171   :  { %v108_v20 = vmax.f32 %v102_v17, %v106_v19  ;;  %v111_v30 = vmul.f32 1.442695, %v109_v18 }
 0x173   :  { %v110_v21 = vsub.f32 %v102_v17, %v108_v20  ;;  %145 = vst.msk [vmem:[#allocation2 + $0x8] sm:$0xff] %vm21_vm2, %v108_v20  ;;  %126 = vperm.xlu1 %218, %v108_v20  }
 0x175   :  { %v113_v31 = vmul.f32 1.442695, %v110_v21 }
 0x176   :  { %v159_v46 = vld [vmem:[#allocation2] sm:$0xff] }
 0x17a   :  { %v160_v50 = vld [vmem:[#allocation2 + $0x8] sm:$0xff] }
 0x1ee   :  { %v122_v22 = vpop.permute.xlu1 %121 }
 0x1ef   :  { %v129_v23 = vsub.f32 %v95_v7, %v122_v22 }
 0x1f1   :  { %v131_v24 = vmul.f32 1.442695, %v129_v23 }
 0x1f2   :  { %v127_v25 = vpop.permute.xlu1 %126 }
 0x1f3   :  { %223 = vpow2.f32 %v131_v24  ;;  %v130_v26 = vsub.f32 %v98_v10, %v127_v25 }
 0x1f5   :  { %v133_v27 = vmul.f32 1.442695, %v130_v26 }
 0x1f7   :  { %225 = vpow2.f32 %v133_v27 }
 0x1f8   :  { %227 = vpow2.f32 %v111_v30 }
 0x1f9   :  { %229 = vpow2.f32 %v113_v31 }
 0x1fd   :  { %v224_v28 = vpop.eup %223 }
 0x1fe   :  { %135 = vadd.xlane.f32.xlu0 %v224_v28 }
 0x201   :  { %v226_v29 = vpop.eup %225 }
 0x202   :  { %137 = vadd.xlane.f32.xlu1 %v226_v29  ;;  %v228_v32 = vpop.eup %227 }
 0x203   :  { %v117_v34 = vmul.f32 %v228_v32, %v115_v33  ;;  %v230_v35 = vpop.eup %229 }
 0x204   :  { %v118_v39 = vmul.f32 %v230_v35, %v116_v37 }
 0x28b   :  { %v136_v36 = vpop.xlane.xlu0 %135 }
 0x28c   :  { %v139_v38 = vadd.f32 %v136_v36, %v117_v34 }
 0x28e   :  { %142 = vst.msk [vmem:[#allocation3] sm:$0xff] %vm21_vm2, %v139_v38 }
 0x28f   :  { %v138_v40 = vpop.xlane.xlu1 %137 }
 0x290   :  { %v140_v41 = vadd.f32 %v138_v40, %v118_v39 }
 0x292   :  { %143 = vst.msk [vmem:[#allocation3 + $0x8] sm:$0xff] %vm21_vm2, %v140_v41 }
 0x295   :  { %v161_v42 = vld [vmem:[#allocation3] sm:$0xff] }
 0x296   :  { %231 = vlog2.f32 %v161_v42 }
 0x299   :  { %v162_v43 = vld [vmem:[#allocation3 + $0x8] sm:$0xff] }
 0x29a   :  { %233 = vlog2.f32 %v162_v43 }
 0x2a0   :  { %v232_v44 = vpop.eup %231 }
 0x2a1   :  { %v164_v45 = vmul.f32 0.6931472, %v232_v44 }
 0x2a3   :  { %v167_v47 = vadd.f32 %v164_v45, %v159_v46 }
 0x2a4   :  { %v234_v48 = vpop.eup %233 }
 0x2a5   :  { %171 = vperm.xlu0 %219, %v167_v47   ;;  %v166_v49 = vmul.f32 0.6931472, %v234_v48 }
 0x2a7   :  { %v168_v51 = vadd.f32 %v166_v49, %v160_v50 }
 0x2a9   :  { %176 = vperm.xlu1 %218, %v168_v51  }
 0x324   :  { %v172_v52 = vpop.permute.xlu0 %171 }
 0x325   :  { %179 = vst [vmem:[%s297_s4] sm:$0xff] %v172_v52 }
 0x328   :  { %v177_v53 = vpop.permute.xlu1 %176 }
 0x329   :  { %180 = vst [vmem:[%s297_s4 + $0x8] sm:$0xff] %v177_v53 }

</bundles_post_ra>
